<compile_context>
chip_gen: v7x
topology: tpu7x:2x2x1
jax: 0.10.0
libtpu: 0.0.40
codegen_flags: <defaults>
</compile_context>

<pallas_src>
import functools

import jax
import jax.numpy as jnp
from jax.experimental import pallas as pl
from jax.experimental.pallas import tpu as pltpu

_PAD_LOGIT = -30000.0          # sigmoid(-30000) == 0 exactly; softmax stays finite
_PAD_LABEL = -(2 ** 31 - 1)    # never a real class id / ignore index


def _dice_sums_kernel(x_ref, t_ref, out_ref, acc_ref, *,
                      apply_softmax: bool, mask_pad: bool, n_classes: int):
    """One (C, S_tile, 128) logits tile + (1, S_tile, 128) labels tile.

    Accumulates, per class c, lane-dense (8, 128) partial sums of
      intersect[c] = sum(score_c * onehot_c)
      y_sum[c]     = sum(onehot_c)            (onehot^2 == onehot)
      z_sum[c]     = sum(score_c^2)
    into the batch-resident (3, C, 8, 128) VMEM scratch.
    """
    j = pl.program_id(1)

    @pl.when(j == 0)
    def _():
        acc_ref[...] = jnp.zeros_like(acc_ref)

    x = x_ref[...].astype(jnp.float32)          # (C, S_tile, 128), cast in-kernel
    labels = t_ref[0]                           # (S_tile, 128) int32

    if apply_softmax:
        # C is a small leading (non-vreg) axis: max/sum over it are C-1
        # elementwise VPU ops, not sublane reductions.
        m = jnp.max(x, axis=0, keepdims=True)
        e = jnp.exp(x - m)
        denom = jnp.sum(e, axis=0, keepdims=True)          # (1, S_tile, 128)
        r = pl.reciprocal(denom, approx=True)               # EUP
        r = r * (2.0 - denom * r)                            # one Newton step
        score = e * r
    else:
        score = jax.nn.sigmoid(x)

    if mask_pad:
        # Only the softmax path on ragged shapes: padded columns would add
        # (1/C)^2 per class to z_sum, so zero their scores.  Padded labels
        # carry a sentinel that never matches a real class, so intersect and
        # y_sum need no masking on either path.
        score = jnp.where((labels != _PAD_LABEL)[None], score, 0.0)

    _, s_tile, _ = x_ref.shape
    r_blocks = s_tile // 8                       # S_tile is a multiple of 8
    for c in range(n_classes):                   # small unrolled class loop
        eq = labels == c                         # (S_tile, 128) bool
        sc = score[c]                            # (S_tile, 128) f32
        inter_p = jnp.sum(jnp.where(eq, sc, 0.0).reshape(r_blocks, 8, 128), axis=0)
        ysum_p = jnp.sum(jnp.where(eq, 1.0, 0.0).reshape(r_blocks, 8, 128), axis=0)
        zsum_p = jnp.sum((sc * sc).reshape(r_blocks, 8, 128), axis=0)
        acc_ref[0, c] += inter_p                 # full-vreg VPU adds, no XLU
        acc_ref[1, c] += ysum_p
        acc_ref[2, c] += zsum_p

    @pl.when(j == pl.num_programs(1) - 1)
    def _():
        out_ref[...] = acc_ref[...]              # lane-dense write, once per batch


def _pick_s_tile(n_classes, s_full, x_itemsize):
    """Pixel-row tile (rows of 128 lanes), multiple of 8, VMEM-budgeted.

    Budgets the double-buffered streamed blocks AND ~4x C*rows of f32
    elementwise intermediates; caps at 1024 rows (128K pixels).  Prefers a
    tile that divides the row extent so no padding copy is needed.
    """
    budget = 14 * 1024 * 1024
    per_row = 2 * 128 * (n_classes * x_itemsize + 4) + 4 * n_classes * 128 * 4
    cap = budget // per_row
    cap = max(8, min(1024, (cap // 8) * 8))
    if s_full <= cap:
        return ((s_full + 7) // 8) * 8
    if s_full % 8 == 0:
        d = cap
        while d >= max(8, cap // 2):
            if s_full % d == 0:
                return d
            d -= 8
    return cap


def dice_loss(inputs, target, n_classes, weight=None, softmax=False, s_tile=None):
    """Pallas implementation of DiceLoss.forward (PyTorch reference)."""
    B, C, H, W = inputs.shape
    assert C == n_classes, f"channels {C} != n_classes {n_classes}"
    HW = H * W

    x = inputs.reshape(B, C, HW)
    # Labels are the small stream (1/C of the logits); int32 end-to-end.
    t = target.reshape(B, 1, HW).astype(jnp.int32)

    s_full = pl.cdiv(HW, 128)
    if s_tile is None:
        s_tile = _pick_s_tile(C, s_full, jnp.dtype(x.dtype).itemsize)
    else:
        s_tile = max(8, (int(s_tile) // 8) * 8)
    n_tiles = pl.cdiv(s_full, s_tile)
    s_pad = n_tiles * s_tile
    hw_pad = s_pad * 128

    if hw_pad != HW:
        # One-time pad (ragged shapes only) so the grid tiles exactly: no
        # unspecified HBM reads, and no per-tile masking on the sigmoid path.
        pad = hw_pad - HW
        x = jnp.pad(x, ((0, 0), (0, 0), (0, pad)), constant_values=_PAD_LOGIT)
        t = jnp.pad(t, ((0, 0), (0, 0), (0, pad)), constant_values=_PAD_LABEL)

    x4 = x.reshape(B, C, s_pad, 128)
    t4 = t.reshape(B, 1, s_pad, 128)

    mask_pad = bool(softmax) and (hw_pad != HW)
    kernel = functools.partial(_dice_sums_kernel, apply_softmax=bool(softmax),
                               mask_pad=mask_pad, n_classes=n_classes)

    partials = pl.pallas_call(
        kernel,
        out_shape=jax.ShapeDtypeStruct((B, 3, C, 8, 128), jnp.float32),
        grid_spec=pltpu.PrefetchScalarGridSpec(
            num_scalar_prefetch=0,
            grid=(B, n_tiles),
            in_specs=[
                pl.BlockSpec((pl.Squeezed(), C, s_tile, 128),
                             lambda b, j: (b, 0, j, 0)),
                pl.BlockSpec((pl.Squeezed(), 1, s_tile, 128),
                             lambda b, j: (b, 0, j, 0)),
            ],
            out_specs=pl.BlockSpec((pl.Squeezed(), 3, C, 8, 128),
                                   lambda b, j: (b, 0, 0, 0, 0)),
            scratch_shapes=[pltpu.VMEM((3, C, 8, 128), jnp.float32)],
        ),
        compiler_params=pltpu.CompilerParams(
            dimension_semantics=("parallel", "arbitrary"),
            vmem_limit_bytes=32 * 1024 * 1024),
    )(x4, t4)

    # Tiny epilogue: reduce batch / sublane / lane axes of the partial sums.
    totals = jnp.sum(partials, axis=(0, 3, 4))          # (3, C)
    inter, ysum, zsum = totals[0], totals[1], totals[2]

    smooth = 1e-5
    dice = 1.0 - (2.0 * inter + smooth) / (zsum + ysum + smooth)   # per class
    if weight is None:
        weight = jnp.ones((n_classes,), jnp.float32)
    else:
        weight = jnp.asarray(weight, jnp.float32)
    return jnp.sum(dice * weight) / n_classes


def _dice_loss_ref(inputs, target, n_classes, weight=None, softmax=False):
    """Pure-JAX reference mirroring the PyTorch module."""
    if softmax:
        score = jax.nn.softmax(inputs, axis=1)
    else:
        score = jax.nn.sigmoid(inputs)
    onehot = (target[:, None, :, :] ==
              jnp.arange(n_classes)[None, :, None, None]).astype(jnp.float32)
    if weight is None:
        weight = jnp.ones((n_classes,), jnp.float32)
    smooth = 1e-5
    loss = 0.0
    for i in range(n_classes):
        s = score[:, i]
        t = onehot[:, i]
        intersect = jnp.sum(s * t)
        y_sum = jnp.sum(t * t)
        z_sum = jnp.sum(s * s)
        dice = 1.0 - (2.0 * intersect + smooth) / (z_sum + y_sum + smooth)
        loss = loss + dice * weight[i]
    return loss / n_classes


if __name__ == "__main__":
    key = jax.random.PRNGKey(0)
    k1, k2, k3, k4 = jax.random.split(key, 4)

    # Main case: (B, C, H, W) = (2, 4, 16, 16).
    B, C, H, W = 2, 4, 16, 16
    inputs = jax.random.normal(k1, (B, C, H, W), dtype=jnp.float32)
    target = jax.random.randint(k2, (B, H, W), 0, C, dtype=jnp.int32)

    out = jax.block_until_ready(dice_loss(inputs, target, n_classes=C))
    ref = _dice_loss_ref(inputs, target, n_classes=C)
    assert jnp.allclose(out, ref, atol=5e-5, rtol=5e-5), (out, ref)

    out_sm = jax.block_until_ready(
        dice_loss(inputs, target, n_classes=C, softmax=True))
    ref_sm = _dice_loss_ref(inputs, target, n_classes=C, softmax=True)
    assert jnp.allclose(out_sm, ref_sm, atol=5e-5, rtol=5e-5), (out_sm, ref_sm)

    # Ragged multi-tile case (exercises padding, the forced small row-tile and
    # the softmax pad mask): H*W = 1600 -> 13 rows of 128, tile = 8 rows.
    B2, C2, H2, W2 = 2, 3, 40, 40
    inputs2 = jax.random.normal(k3, (B2, C2, H2, W2), dtype=jnp.float32)
    target2 = jax.random.randint(k4, (B2, H2, W2), 0, C2, dtype=jnp.int32)
    w2 = [0.2, 0.5, 0.3]

    out2 = jax.block_until_ready(
        dice_loss(inputs2, target2, n_classes=C2, weight=w2, s_tile=8))
    ref2 = _dice_loss_ref(inputs2, target2, n_classes=C2,
                          weight=jnp.asarray(w2, jnp.float32))
    assert jnp.allclose(out2, ref2, atol=5e-5, rtol=5e-5), (out2, ref2)

    out2_sm = jax.block_until_ready(
        dice_loss(inputs2, target2, n_classes=C2, softmax=True, s_tile=8))
    ref2_sm = _dice_loss_ref(inputs2, target2, n_classes=C2, softmax=True)
    assert jnp.allclose(out2_sm, ref2_sm, atol=5e-5, rtol=5e-5), (out2_sm,
                                                                  ref2_sm)

    print("KERNEL_OK")
</pallas_src>

<mosaic_0001>
module attributes {stable_mosaic.version = 11 : i64} {
  func.func @_dice_sums_kernel(%arg0: i32, %arg1: i32, %arg2: memref<1x4x8x128xf32, #tpu.memory_space<vmem>>, %arg3: memref<1x1x8x128xi32, #tpu.memory_space<vmem>>, %arg4: memref<1x3x4x8x128xf32, #tpu.memory_space<vmem>>, %arg5: memref<3x4x8x128xf32, #tpu.memory_space<vmem>>) attributes {dimension_semantics = [#tpu.dimension_semantics<parallel>, #tpu.dimension_semantics<arbitrary>], iteration_bounds = array<i64: 2, 1>, scalar_prefetch = 0 : i64, scratch_operands = 1 : i64, tpu.core_type = #tpu.core_type<tc>, window_params = [{transform_indices = @transform_0, window_bounds = array<i64: 1, 4, 8, 128>}, {transform_indices = @transform_1, window_bounds = array<i64: 1, 1, 8, 128>}, {transform_indices = @transform_2, window_bounds = array<i64: 1, 3, 4, 8, 128>}]} {
    %c0_i32 = arith.constant 0 : i32
    %0 = arith.cmpi eq, %arg1, %c0_i32 : i32
    %1 = arith.extui %0 : i1 to i32
    %c0_i32_0 = arith.constant 0 : i32
    %2 = arith.cmpi ne, %1, %c0_i32_0 : i32
    scf.if %2 {
      %cst_128 = arith.constant 0.000000e+00 : f32
      %151 = vector.broadcast %cst_128 : f32 to vector<3x4x8x128xf32>
      %c0_129 = arith.constant 0 : index
      %c0_130 = arith.constant 0 : index
      %c0_131 = arith.constant 0 : index
      %c0_132 = arith.constant 0 : index
      %152 = vector.load %arg5[%c0_129, %c0_130, %c0_131, %c0_132] : memref<3x4x8x128xf32, #tpu.memory_space<vmem>>, vector<3x4x8x128xf32>
      tpu.vector_store %arg5[%c0_129, %c0_130, %c0_131, %c0_132], %151 {strides = array<i32>} : memref<3x4x8x128xf32, #tpu.memory_space<vmem>>, vector<3x4x8x128xf32>,
    } else {
    }
    %c0 = arith.constant 0 : index
    %c0_1 = arith.constant 0 : index
    %c0_2 = arith.constant 0 : index
    %c0_3 = arith.constant 0 : index
    %3 = vector.load %arg2[%c0, %c0_1, %c0_2, %c0_3] : memref<1x4x8x128xf32, #tpu.memory_space<vmem>>, vector<1x4x8x128xf32>
    %4 = vector.shape_cast %3 : vector<1x4x8x128xf32> to vector<4x8x128xf32>
    %c0_4 = arith.constant 0 : index
    %c0_5 = arith.constant 0 : index
    %c0_6 = arith.constant 0 : index
    %c0_7 = arith.constant 0 : index
    %5 = vector.load %arg3[%c0_4, %c0_5, %c0_6, %c0_7] : memref<1x1x8x128xi32, #tpu.memory_space<vmem>>, vector<1x1x8x128xi32>
    %6 = vector.shape_cast %5 : vector<1x1x8x128xi32> to vector<8x128xi32>
    %7 = arith.negf %4 : vector<4x8x128xf32>
    %8 = math.exp %7 : vector<4x8x128xf32>
    %cst = arith.constant 1.000000e+00 : f32
    %9 = vector.broadcast %cst : f32 to vector<4x8x128xf32>
    %10 = arith.addf %9, %8 : vector<4x8x128xf32>
    %11 = arith.divf %9, %10 : vector<4x8x128xf32>
    %c0_i32_8 = arith.constant 0 : i32
    %12 = vector.broadcast %c0_i32_8 : i32 to vector<8x128xi32>
    %13 = arith.cmpi eq, %6, %12 : vector<8x128xi32>
    %14 = vector.extract_strided_slice %11 {offsets = [0, 0, 0], sizes = [1, 8, 128], strides = [1, 1, 1]} : vector<4x8x128xf32> to vector<1x8x128xf32>
    %15 = vector.shape_cast %14 : vector<1x8x128xf32> to vector<8x128xf32>
    %cst_9 = arith.constant 0.000000e+00 : f32
    %16 = vector.broadcast %cst_9 : f32 to vector<8x128xf32>
    %17 = arith.select %13, %15, %16 : vector<8x128xi1>, vector<8x128xf32>
    %18 = vector.shape_cast %17 : vector<8x128xf32> to vector<1x8x128xf32>
    %cst_10 = arith.constant dense<0.000000e+00> : vector<8x128xf32>
    %19 = vector.multi_reduction <add>, %18, %cst_10 [0] : vector<1x8x128xf32> to vector<8x128xf32>
    %cst_11 = arith.constant 1.000000e+00 : f32
    %cst_12 = arith.constant 0.000000e+00 : f32
    %20 = vector.broadcast %cst_11 : f32 to vector<8x128xf32>
    %21 = vector.broadcast %cst_12 : f32 to vector<8x128xf32>
    %22 = arith.select %13, %20, %21 : vector<8x128xi1>, vector<8x128xf32>
    %23 = vector.shape_cast %22 : vector<8x128xf32> to vector<1x8x128xf32>
    %cst_13 = arith.constant dense<0.000000e+00> : vector<8x128xf32>
    %24 = vector.multi_reduction <add>, %23, %cst_13 [0] : vector<1x8x128xf32> to vector<8x128xf32>
    %25 = arith.mulf %15, %15 : vector<8x128xf32>
    %26 = vector.shape_cast %25 : vector<8x128xf32> to vector<1x8x128xf32>
    %cst_14 = arith.constant dense<0.000000e+00> : vector<8x128xf32>
    %27 = vector.multi_reduction <add>, %26, %cst_14 [0] : vector<1x8x128xf32> to vector<8x128xf32>
    %c0_15 = arith.constant 0 : index
    %c0_16 = arith.constant 0 : index
    %c0_17 = arith.constant 0 : index
    %c0_18 = arith.constant 0 : index
    %28 = vector.load %arg5[%c0_15, %c0_16, %c0_17, %c0_18] : memref<3x4x8x128xf32, #tpu.memory_space<vmem>>, vector<1x1x8x128xf32>
    %29 = vector.shape_cast %28 : vector<1x1x8x128xf32> to vector<8x128xf32>
    %30 = arith.addf %29, %19 : vector<8x128xf32>
    %c0_19 = arith.constant 0 : index
    %c0_20 = arith.constant 0 : index
    %c0_21 = arith.constant 0 : index
    %c0_22 = arith.constant 0 : index
    %31 = vector.load %arg5[%c0_19, %c0_20, %c0_21, %c0_22] : memref<3x4x8x128xf32, #tpu.memory_space<vmem>>, vector<1x1x8x128xf32>
    %32 = vector.shape_cast %31 : vector<1x1x8x128xf32> to vector<8x128xf32>
    %33 = vector.shape_cast %30 : vector<8x128xf32> to vector<1x1x8x128xf32>
    tpu.vector_store %arg5[%c0_19, %c0_20, %c0_21, %c0_22], %33 {strides = array<i32>} : memref<3x4x8x128xf32, #tpu.memory_space<vmem>>, vector<1x1x8x128xf32>,
    %c1 = arith.constant 1 : index
    %c0_23 = arith.constant 0 : index
    %c0_24 = arith.constant 0 : index
    %c0_25 = arith.constant 0 : index
    %34 = vector.load %arg5[%c1, %c0_23, %c0_24, %c0_25] : memref<3x4x8x128xf32, #tpu.memory_space<vmem>>, vector<1x1x8x128xf32>
    %35 = vector.shape_cast %34 : vector<1x1x8x128xf32> to vector<8x128xf32>
    %36 = arith.addf %35, %24 : vector<8x128xf32>
    %c1_26 = arith.constant 1 : index
    %c0_27 = arith.constant 0 : index
    %c0_28 = arith.constant 0 : index
    %c0_29 = arith.constant 0 : index
    %37 = vector.load %arg5[%c1_26, %c0_27, %c0_28, %c0_29] : memref<3x4x8x128xf32, #tpu.memory_space<vmem>>, vector<1x1x8x128xf32>
    %38 = vector.shape_cast %37 : vector<1x1x8x128xf32> to vector<8x128xf32>
    %39 = vector.shape_cast %36 : vector<8x128xf32> to vector<1x1x8x128xf32>
    tpu.vector_store %arg5[%c1_26, %c0_27, %c0_28, %c0_29], %39 {strides = array<i32>} : memref<3x4x8x128xf32, #tpu.memory_space<vmem>>, vector<1x1x8x128xf32>,
    %c2 = arith.constant 2 : index
    %c0_30 = arith.constant 0 : index
    %c0_31 = arith.constant 0 : index
    %c0_32 = arith.constant 0 : index
    %40 = vector.load %arg5[%c2, %c0_30, %c0_31, %c0_32] : memref<3x4x8x128xf32, #tpu.memory_space<vmem>>, vector<1x1x8x128xf32>
    %41 = vector.shape_cast %40 : vector<1x1x8x128xf32> to vector<8x128xf32>
    %42 = arith.addf %41, %27 : vector<8x128xf32>
    %c2_33 = arith.constant 2 : index
    %c0_34 = arith.constant 0 : index
    %c0_35 = arith.constant 0 : index
    %c0_36 = arith.constant 0 : index
    %43 = vector.load %arg5[%c2_33, %c0_34, %c0_35, %c0_36] : memref<3x4x8x128xf32, #tpu.memory_space<vmem>>, vector<1x1x8x128xf32>
    %44 = vector.shape_cast %43 : vector<1x1x8x128xf32> to vector<8x128xf32>
    %45 = vector.shape_cast %42 : vector<8x128xf32> to vector<1x1x8x128xf32>
    tpu.vector_store %arg5[%c2_33, %c0_34, %c0_35, %c0_36], %45 {strides = array<i32>} : memref<3x4x8x128xf32, #tpu.memory_space<vmem>>, vector<1x1x8x128xf32>,
    %c1_i32 = arith.constant 1 : i32
    %46 = vector.broadcast %c1_i32 : i32 to vector<8x128xi32>
    %47 = arith.cmpi eq, %6, %46 : vector<8x128xi32>
    %48 = vector.extract_strided_slice %11 {offsets = [1, 0, 0], sizes = [1, 8, 128], strides = [1, 1, 1]} : vector<4x8x128xf32> to vector<1x8x128xf32>
    %49 = vector.shape_cast %48 : vector<1x8x128xf32> to vector<8x128xf32>
    %cst_37 = arith.constant 0.000000e+00 : f32
    %50 = vector.broadcast %cst_37 : f32 to vector<8x128xf32>
    %51 = arith.select %47, %49, %50 : vector<8x128xi1>, vector<8x128xf32>
    %52 = vector.shape_cast %51 : vector<8x128xf32> to vector<1x8x128xf32>
    %cst_38 = arith.constant dense<0.000000e+00> : vector<8x128xf32>
    %53 = vector.multi_reduction <add>, %52, %cst_38 [0] : vector<1x8x128xf32> to vector<8x128xf32>
    %cst_39 = arith.constant 1.000000e+00 : f32
    %cst_40 = arith.constant 0.000000e+00 : f32
    %54 = vector.broadcast %cst_39 : f32 to vector<8x128xf32>
    %55 = vector.broadcast %cst_40 : f32 to vector<8x128xf32>
    %56 = arith.select %47, %54, %55 : vector<8x128xi1>, vector<8x128xf32>
    %57 = vector.shape_cast %56 : vector<8x128xf32> to vector<1x8x128xf32>
    %cst_41 = arith.constant dense<0.000000e+00> : vector<8x128xf32>
    %58 = vector.multi_reduction <add>, %57, %cst_41 [0] : vector<1x8x128xf32> to vector<8x128xf32>
    %59 = arith.mulf %49, %49 : vector<8x128xf32>
    %60 = vector.shape_cast %59 : vector<8x128xf32> to vector<1x8x128xf32>
    %cst_42 = arith.constant dense<0.000000e+00> : vector<8x128xf32>
    %61 = vector.multi_reduction <add>, %60, %cst_42 [0] : vector<1x8x128xf32> to vector<8x128xf32>
    %c0_43 = arith.constant 0 : index
    %c1_44 = arith.constant 1 : index
    %c0_45 = arith.constant 0 : index
    %c0_46 = arith.constant 0 : index
    %62 = vector.load %arg5[%c0_43, %c1_44, %c0_45, %c0_46] : memref<3x4x8x128xf32, #tpu.memory_space<vmem>>, vector<1x1x8x128xf32>
    %63 = vector.shape_cast %62 : vector<1x1x8x128xf32> to vector<8x128xf32>
    %64 = arith.addf %63, %53 : vector<8x128xf32>
    %c0_47 = arith.constant 0 : index
    %c1_48 = arith.constant 1 : index
    %c0_49 = arith.constant 0 : index
    %c0_50 = arith.constant 0 : index
    %65 = vector.load %arg5[%c0_47, %c1_48, %c0_49, %c0_50] : memref<3x4x8x128xf32, #tpu.memory_space<vmem>>, vector<1x1x8x128xf32>
    %66 = vector.shape_cast %65 : vector<1x1x8x128xf32> to vector<8x128xf32>
    %67 = vector.shape_cast %64 : vector<8x128xf32> to vector<1x1x8x128xf32>
    tpu.vector_store %arg5[%c0_47, %c1_48, %c0_49, %c0_50], %67 {strides = array<i32>} : memref<3x4x8x128xf32, #tpu.memory_space<vmem>>, vector<1x1x8x128xf32>,
    %c1_51 = arith.constant 1 : index
    %c1_52 = arith.constant 1 : index
    %c0_53 = arith.constant 0 : index
    %c0_54 = arith.constant 0 : index
    %68 = vector.load %arg5[%c1_51, %c1_52, %c0_53, %c0_54] : memref<3x4x8x128xf32, #tpu.memory_space<vmem>>, vector<1x1x8x128xf32>
    %69 = vector.shape_cast %68 : vector<1x1x8x128xf32> to vector<8x128xf32>
    %70 = arith.addf %69, %58 : vector<8x128xf32>
    %c1_55 = arith.constant 1 : index
    %c1_56 = arith.constant 1 : index
    %c0_57 = arith.constant 0 : index
    %c0_58 = arith.constant 0 : index
    %71 = vector.load %arg5[%c1_55, %c1_56, %c0_57, %c0_58] : memref<3x4x8x128xf32, #tpu.memory_space<vmem>>, vector<1x1x8x128xf32>
    %72 = vector.shape_cast %71 : vector<1x1x8x128xf32> to vector<8x128xf32>
    %73 = vector.shape_cast %70 : vector<8x128xf32> to vector<1x1x8x128xf32>
    tpu.vector_store %arg5[%c1_55, %c1_56, %c0_57, %c0_58], %73 {strides = array<i32>} : memref<3x4x8x128xf32, #tpu.memory_space<vmem>>, vector<1x1x8x128xf32>,
    %c2_59 = arith.constant 2 : index
    %c1_60 = arith.constant 1 : index
    %c0_61 = arith.constant 0 : index
    %c0_62 = arith.constant 0 : index
    %74 = vector.load %arg5[%c2_59, %c1_60, %c0_61, %c0_62] : memref<3x4x8x128xf32, #tpu.memory_space<vmem>>, vector<1x1x8x128xf32>
    %75 = vector.shape_cast %74 : vector<1x1x8x128xf32> to vector<8x128xf32>
    %76 = arith.addf %75, %61 : vector<8x128xf32>
    %c2_63 = arith.constant 2 : index
    %c1_64 = arith.constant 1 : index
    %c0_65 = arith.constant 0 : index
    %c0_66 = arith.constant 0 : index
    %77 = vector.load %arg5[%c2_63, %c1_64, %c0_65, %c0_66] : memref<3x4x8x128xf32, #tpu.memory_space<vmem>>, vector<1x1x8x128xf32>
    %78 = vector.shape_cast %77 : vector<1x1x8x128xf32> to vector<8x128xf32>
    %79 = vector.shape_cast %76 : vector<8x128xf32> to vector<1x1x8x128xf32>
    tpu.vector_store %arg5[%c2_63, %c1_64, %c0_65, %c0_66], %79 {strides = array<i32>} : memref<3x4x8x128xf32, #tpu.memory_space<vmem>>, vector<1x1x8x128xf32>,
    %c2_i32 = arith.constant 2 : i32
    %80 = vector.broadcast %c2_i32 : i32 to vector<8x128xi32>
    %81 = arith.cmpi eq, %6, %80 : vector<8x128xi32>
    %82 = vector.extract_strided_slice %11 {offsets = [2, 0, 0], sizes = [1, 8, 128], strides = [1, 1, 1]} : vector<4x8x128xf32> to vector<1x8x128xf32>
    %83 = vector.shape_cast %82 : vector<1x8x128xf32> to vector<8x128xf32>
    %cst_67 = arith.constant 0.000000e+00 : f32
    %84 = vector.broadcast %cst_67 : f32 to vector<8x128xf32>
    %85 = arith.select %81, %83, %84 : vector<8x128xi1>, vector<8x128xf32>
    %86 = vector.shape_cast %85 : vector<8x128xf32> to vector<1x8x128xf32>
    %cst_68 = arith.constant dense<0.000000e+00> : vector<8x128xf32>
    %87 = vector.multi_reduction <add>, %86, %cst_68 [0] : vector<1x8x128xf32> to vector<8x128xf32>
    %cst_69 = arith.constant 1.000000e+00 : f32
    %cst_70 = arith.constant 0.000000e+00 : f32
    %88 = vector.broadcast %cst_69 : f32 to vector<8x128xf32>
    %89 = vector.broadcast %cst_70 : f32 to vector<8x128xf32>
    %90 = arith.select %81, %88, %89 : vector<8x128xi1>, vector<8x128xf32>
    %91 = vector.shape_cast %90 : vector<8x128xf32> to vector<1x8x128xf32>
    %cst_71 = arith.constant dense<0.000000e+00> : vector<8x128xf32>
    %92 = vector.multi_reduction <add>, %91, %cst_71 [0] : vector<1x8x128xf32> to vector<8x128xf32>
    %93 = arith.mulf %83, %83 : vector<8x128xf32>
    %94 = vector.shape_cast %93 : vector<8x128xf32> to vector<1x8x128xf32>
    %cst_72 = arith.constant dense<0.000000e+00> : vector<8x128xf32>
    %95 = vector.multi_reduction <add>, %94, %cst_72 [0] : vector<1x8x128xf32> to vector<8x128xf32>
    %c0_73 = arith.constant 0 : index
    %c2_74 = arith.constant 2 : index
    %c0_75 = arith.constant 0 : index
    %c0_76 = arith.constant 0 : index
    %96 = vector.load %arg5[%c0_73, %c2_74, %c0_75, %c0_76] : memref<3x4x8x128xf32, #tpu.memory_space<vmem>>, vector<1x1x8x128xf32>
    %97 = vector.shape_cast %96 : vector<1x1x8x128xf32> to vector<8x128xf32>
    %98 = arith.addf %97, %87 : vector<8x128xf32>
    %c0_77 = arith.constant 0 : index
    %c2_78 = arith.constant 2 : index
    %c0_79 = arith.constant 0 : index
    %c0_80 = arith.constant 0 : index
    %99 = vector.load %arg5[%c0_77, %c2_78, %c0_79, %c0_80] : memref<3x4x8x128xf32, #tpu.memory_space<vmem>>, vector<1x1x8x128xf32>
    %100 = vector.shape_cast %99 : vector<1x1x8x128xf32> to vector<8x128xf32>
    %101 = vector.shape_cast %98 : vector<8x128xf32> to vector<1x1x8x128xf32>
    tpu.vector_store %arg5[%c0_77, %c2_78, %c0_79, %c0_80], %101 {strides = array<i32>} : memref<3x4x8x128xf32, #tpu.memory_space<vmem>>, vector<1x1x8x128xf32>,
    %c1_81 = arith.constant 1 : index
    %c2_82 = arith.constant 2 : index
    %c0_83 = arith.constant 0 : index
    %c0_84 = arith.constant 0 : index
    %102 = vector.load %arg5[%c1_81, %c2_82, %c0_83, %c0_84] : memref<3x4x8x128xf32, #tpu.memory_space<vmem>>, vector<1x1x8x128xf32>
    %103 = vector.shape_cast %102 : vector<1x1x8x128xf32> to vector<8x128xf32>
    %104 = arith.addf %103, %92 : vector<8x128xf32>
    %c1_85 = arith.constant 1 : index
    %c2_86 = arith.constant 2 : index
    %c0_87 = arith.constant 0 : index
    %c0_88 = arith.constant 0 : index
    %105 = vector.load %arg5[%c1_85, %c2_86, %c0_87, %c0_88] : memref<3x4x8x128xf32, #tpu.memory_space<vmem>>, vector<1x1x8x128xf32>
    %106 = vector.shape_cast %105 : vector<1x1x8x128xf32> to vector<8x128xf32>
    %107 = vector.shape_cast %104 : vector<8x128xf32> to vector<1x1x8x128xf32>
    tpu.vector_store %arg5[%c1_85, %c2_86, %c0_87, %c0_88], %107 {strides = array<i32>} : memref<3x4x8x128xf32, #tpu.memory_space<vmem>>, vector<1x1x8x128xf32>,
    %c2_89 = arith.constant 2 : index
    %c2_90 = arith.constant 2 : index
    %c0_91 = arith.constant 0 : index
    %c0_92 = arith.constant 0 : index
    %108 = vector.load %arg5[%c2_89, %c2_90, %c0_91, %c0_92] : memref<3x4x8x128xf32, #tpu.memory_space<vmem>>, vector<1x1x8x128xf32>
    %109 = vector.shape_cast %108 : vector<1x1x8x128xf32> to vector<8x128xf32>
    %110 = arith.addf %109, %95 : vector<8x128xf32>
    %c2_93 = arith.constant 2 : index
    %c2_94 = arith.constant 2 : index
    %c0_95 = arith.constant 0 : index
    %c0_96 = arith.constant 0 : index
    %111 = vector.load %arg5[%c2_93, %c2_94, %c0_95, %c0_96] : memref<3x4x8x128xf32, #tpu.memory_space<vmem>>, vector<1x1x8x128xf32>
    %112 = vector.shape_cast %111 : vector<1x1x8x128xf32> to vector<8x128xf32>
    %113 = vector.shape_cast %110 : vector<8x128xf32> to vector<1x1x8x128xf32>
    tpu.vector_store %arg5[%c2_93, %c2_94, %c0_95, %c0_96], %113 {strides = array<i32>} : memref<3x4x8x128xf32, #tpu.memory_space<vmem>>, vector<1x1x8x128xf32>,
    %c3_i32 = arith.constant 3 : i32
    %114 = vector.broadcast %c3_i32 : i32 to vector<8x128xi32>
    %115 = arith.cmpi eq, %6, %114 : vector<8x128xi32>
    %116 = vector.extract_strided_slice %11 {offsets = [3, 0, 0], sizes = [1, 8, 128], strides = [1, 1, 1]} : vector<4x8x128xf32> to vector<1x8x128xf32>
    %117 = vector.shape_cast %116 : vector<1x8x128xf32> to vector<8x128xf32>
    %cst_97 = arith.constant 0.000000e+00 : f32
    %118 = vector.broadcast %cst_97 : f32 to vector<8x128xf32>
    %119 = arith.select %115, %117, %118 : vector<8x128xi1>, vector<8x128xf32>
    %120 = vector.shape_cast %119 : vector<8x128xf32> to vector<1x8x128xf32>
    %cst_98 = arith.constant dense<0.000000e+00> : vector<8x128xf32>
    %121 = vector.multi_reduction <add>, %120, %cst_98 [0] : vector<1x8x128xf32> to vector<8x128xf32>
    %cst_99 = arith.constant 1.000000e+00 : f32
    %cst_100 = arith.constant 0.000000e+00 : f32
    %122 = vector.broadcast %cst_99 : f32 to vector<8x128xf32>
    %123 = vector.broadcast %cst_100 : f32 to vector<8x128xf32>
    %124 = arith.select %115, %122, %123 : vector<8x128xi1>, vector<8x128xf32>
    %125 = vector.shape_cast %124 : vector<8x128xf32> to vector<1x8x128xf32>
    %cst_101 = arith.constant dense<0.000000e+00> : vector<8x128xf32>
    %126 = vector.multi_reduction <add>, %125, %cst_101 [0] : vector<1x8x128xf32> to vector<8x128xf32>
    %127 = arith.mulf %117, %117 : vector<8x128xf32>
    %128 = vector.shape_cast %127 : vector<8x128xf32> to vector<1x8x128xf32>
    %cst_102 = arith.constant dense<0.000000e+00> : vector<8x128xf32>
    %129 = vector.multi_reduction <add>, %128, %cst_102 [0] : vector<1x8x128xf32> to vector<8x128xf32>
    %c0_103 = arith.constant 0 : index
    %c3 = arith.constant 3 : index
    %c0_104 = arith.constant 0 : index
    %c0_105 = arith.constant 0 : index
    %130 = vector.load %arg5[%c0_103, %c3, %c0_104, %c0_105] : memref<3x4x8x128xf32, #tpu.memory_space<vmem>>, vector<1x1x8x128xf32>
    %131 = vector.shape_cast %130 : vector<1x1x8x128xf32> to vector<8x128xf32>
    %132 = arith.addf %131, %121 : vector<8x128xf32>
    %c0_106 = arith.constant 0 : index
    %c3_107 = arith.constant 3 : index
    %c0_108 = arith.constant 0 : index
    %c0_109 = arith.constant 0 : index
    %133 = vector.load %arg5[%c0_106, %c3_107, %c0_108, %c0_109] : memref<3x4x8x128xf32, #tpu.memory_space<vmem>>, vector<1x1x8x128xf32>
    %134 = vector.shape_cast %133 : vector<1x1x8x128xf32> to vector<8x128xf32>
    %135 = vector.shape_cast %132 : vector<8x128xf32> to vector<1x1x8x128xf32>
    tpu.vector_store %arg5[%c0_106, %c3_107, %c0_108, %c0_109], %135 {strides = array<i32>} : memref<3x4x8x128xf32, #tpu.memory_space<vmem>>, vector<1x1x8x128xf32>,
    %c1_110 = arith.constant 1 : index
    %c3_111 = arith.constant 3 : index
    %c0_112 = arith.constant 0 : index
    %c0_113 = arith.constant 0 : index
    %136 = vector.load %arg5[%c1_110, %c3_111, %c0_112, %c0_113] : memref<3x4x8x128xf32, #tpu.memory_space<vmem>>, vector<1x1x8x128xf32>
    %137 = vector.shape_cast %136 : vector<1x1x8x128xf32> to vector<8x128xf32>
    %138 = arith.addf %137, %126 : vector<8x128xf32>
    %c1_114 = arith.constant 1 : index
    %c3_115 = arith.constant 3 : index
    %c0_116 = arith.constant 0 : index
    %c0_117 = arith.constant 0 : index
    %139 = vector.load %arg5[%c1_114, %c3_115, %c0_116, %c0_117] : memref<3x4x8x128xf32, #tpu.memory_space<vmem>>, vector<1x1x8x128xf32>
    %140 = vector.shape_cast %139 : vector<1x1x8x128xf32> to vector<8x128xf32>
    %141 = vector.shape_cast %138 : vector<8x128xf32> to vector<1x1x8x128xf32>
    tpu.vector_store %arg5[%c1_114, %c3_115, %c0_116, %c0_117], %141 {strides = array<i32>} : memref<3x4x8x128xf32, #tpu.memory_space<vmem>>, vector<1x1x8x128xf32>,
    %c2_118 = arith.constant 2 : index
    %c3_119 = arith.constant 3 : index
    %c0_120 = arith.constant 0 : index
    %c0_121 = arith.constant 0 : index
    %142 = vector.load %arg5[%c2_118, %c3_119, %c0_120, %c0_121] : memref<3x4x8x128xf32, #tpu.memory_space<vmem>>, vector<1x1x8x128xf32>
    %143 = vector.shape_cast %142 : vector<1x1x8x128xf32> to vector<8x128xf32>
    %144 = arith.addf %143, %129 : vector<8x128xf32>
    %c2_122 = arith.constant 2 : index
    %c3_123 = arith.constant 3 : index
    %c0_124 = arith.constant 0 : index
    %c0_125 = arith.constant 0 : index
    %145 = vector.load %arg5[%c2_122, %c3_123, %c0_124, %c0_125] : memref<3x4x8x128xf32, #tpu.memory_space<vmem>>, vector<1x1x8x128xf32>
    %146 = vector.shape_cast %145 : vector<1x1x8x128xf32> to vector<8x128xf32>
    %147 = vector.shape_cast %144 : vector<8x128xf32> to vector<1x1x8x128xf32>
    tpu.vector_store %arg5[%c2_122, %c3_123, %c0_124, %c0_125], %147 {strides = array<i32>} : memref<3x4x8x128xf32, #tpu.memory_space<vmem>>, vector<1x1x8x128xf32>,
    %c0_i32_126 = arith.constant 0 : i32
    %148 = arith.cmpi eq, %arg1, %c0_i32_126 : i32
    %149 = arith.extui %148 : i1 to i32
    %c0_i32_127 = arith.constant 0 : i32
    %150 = arith.cmpi ne, %149, %c0_i32_127 : i32
    scf.if %150 {
      %c0_128 = arith.constant 0 : index
      %c0_129 = arith.constant 0 : index
      %c0_130 = arith.constant 0 : index
      %c0_131 = arith.constant 0 : index
      %151 = vector.load %arg5[%c0_128, %c0_129, %c0_130, %c0_131] : memref<3x4x8x128xf32, #tpu.memory_space<vmem>>, vector<3x4x8x128xf32>
      %c0_132 = arith.constant 0 : index
      %c0_133 = arith.constant 0 : index
      %c0_134 = arith.constant 0 : index
      %c0_135 = arith.constant 0 : index
      %c0_136 = arith.constant 0 : index
      %152 = vector.load %arg4[%c0_132, %c0_133, %c0_134, %c0_135, %c0_136] : memref<1x3x4x8x128xf32, #tpu.memory_space<vmem>>, vector<1x3x4x8x128xf32>
      %153 = vector.shape_cast %152 : vector<1x3x4x8x128xf32> to vector<3x4x8x128xf32>
      %154 = vector.shape_cast %151 : vector<3x4x8x128xf32> to vector<1x3x4x8x128xf32>
      tpu.vector_store %arg4[%c0_132, %c0_133, %c0_134, %c0_135, %c0_136], %154 {strides = array<i32>} : memref<1x3x4x8x128xf32, #tpu.memory_space<vmem>>, vector<1x3x4x8x128xf32>,
    } else {
    }
    return
  }
  func.func @transform_0(%arg0: i32, %arg1: i32) -> (i32, i32, i32, i32) {
    %c0_i32 = arith.constant 0 : i32
    %c0_i32_0 = arith.constant 0 : i32
    %c0_i32_1 = arith.constant 0 : i32
    return %arg0, %c0_i32, %arg1, %c0_i32_0 : i32, i32, i32, i32
  }
  func.func @transform_1(%arg0: i32, %arg1: i32) -> (i32, i32, i32, i32) {
    %c0_i32 = arith.constant 0 : i32
    %c0_i32_0 = arith.constant 0 : i32
    %c0_i32_1 = arith.constant 0 : i32
    return %arg0, %c0_i32, %arg1, %c0_i32_0 : i32, i32, i32, i32
  }
  func.func @transform_2(%arg0: i32, %arg1: i32) -> (i32, i32, i32, i32, i32) {
    %c0_i32 = arith.constant 0 : i32
    %c0_i32_0 = arith.constant 0 : i32
    %c0_i32_1 = arith.constant 0 : i32
    %c0_i32_2 = arith.constant 0 : i32
    %c0_i32_3 = arith.constant 0 : i32
    return %arg0, %c0_i32, %c0_i32_0, %c0_i32_1, %c0_i32_2 : i32, i32, i32, i32, i32
  }
}

</mosaic_0001>

<bundles_post_ra>
// kernel: tpu_custom_call.1
= control target key start
LH: loop header
LB: loop body
LE: loop exit
PB: predicated region body
PF: predicated region fallthrough
CT: control target
= control target key end

     0   :  { %7 = vsyncpa [#allocation4], 0  ;;  %s1007_s0 = inlined_call_operand.hbm [shape: f32[2,4,8,128], index: 0, kind: input, shape index: {}]   ;;  %s1008_s1 = inlined_call_operand.hbm [shape: s32[2,1,8,128], index: 1, kind: input, shape index: {}]   ;;  %s1009_s2 = inlined_call_operand.hbm [shape: f32[2,3,4,8,128], index: 2, kind: output, shape index: {}]  }
   0x1   :  { %9 = vsyncpa [#allocation4 + $0x1], 0 }
   0x2   :  { %10 = vsyncpa [#allocation7], 0 }
   0x3   :  { %12 = vsyncpa [#allocation7 + $0x1], 0 }
   0x4   :  { %13 = vsyncpa [#allocation5], 0 }
   0x5   :  { %15 = vsyncpa [#allocation5 + $0x1], 0  ;;  %s766_s9 = smov 0   ;;  %s768_s10 = smov 0  }
   0x6   :  { %s770_s11 = smov 0   ;;  %s772_s12 = smov 0  }
   0x7   :  { %s774_s13 = smov 0   ;;  %s776_s14 = smov 0  }
   0x8 LB: > { %s485_s15 = sadd.s32 4294967295, %s741_s14   ;;  %s486_s16 = sadd.s32 4294967294, %s741_s14   ;;  %s741_s14 = sphi %s776_s14, %s21_s14   ;;  %s737_s13 = sphi %s774_s13, %s1028_s13   ;;  %s733_s12 = sphi %s772_s12, %s1027_s12   ;;  %s729_s11 = sphi %s770_s11, %s1026_s11   ;;  %s725_s10 = sphi %s768_s10, %s1025_s10   ;;  %s721_s9 = sphi %s766_s9, %s1024_s9  }
   0x9   : > { %s33_s17 = sadd.s32 1, %s737_s13  ;;  %s42_s18 = sadd.s32 1, %s729_s11 }
   0xa   : > { %p35_p0 = scmp.ge.s32.totalorder %s33_s17, 2  ;;  %p49_p1 = scmp.ne.s32.totalorder %s729_s11, %s725_s10 }
   0xb   : > { %p50_p2 = scmp.eq.s32.totalorder %s741_s14, 0  ;;  %p55_p3 = scmp.ne.s32.totalorder %s725_s10, %s721_s9 }
   0xc   : > { %s1030_s17 = smov (%p35_p0, %s33_s17), 0  ;;  %p56_p5 = scmp.eq.s32.totalorder %s485_s15, 0 }
   0xd   : > { %p807_p4 = por %p50_p2, %p49_p1  ;;  %s37_s20 = ssub.s32 %s737_s13, %s1030_s17 }
   0xe   : > { %p107_p6 = scmp.eq.s32.totalorder %s485_s15, 1  ;;  %p40_p7 = scmp.eq.s32.totalorder %s37_s20, 0 }
   0xf   : > { %p813_p8 = por %p56_p5, %p55_p3  ;;  %p113_p10 = scmp.eq.s32.totalorder %s486_s16, 1 }
  0x10   : > { %p817_p9 = por %p107_p6, %p49_p1  ;;  %p524_p13 = scmp.lt.s32.totalorder %s741_s14, 2 }
  0x11   : > { %s1013_s21 = scalar_select %p813_p8, 1, 0 }
  0x12   : > { %s1014_s22 = scalar_select %p817_p9, 1, 0 }
  0x13   : > { %s822_s23 = scalar_select %p40_p7, %s729_s11, %s42_s18  }
  0x14   : > { %p824_p11 = por %p113_p10, %p55_p3  ;;  %s831_s25 = sand.u32 1, %s729_s11  }
  0x15   : > { %s489_s26 = sshll.u32 %s831_s25, 5  ;;  %s504_s27 = sshll.u32 %s737_s13, 9 }
  0x16   : > { %s1015_s24 = scalar_select %p824_p11, 1, 0 }
  0x17   : > { %s838_s30 = scalar_lea.hbm %s1007_s0, %s504_s27  ;;  %s137_s3 = scalar_lea.vmem [#allocation3], %s489_s26 }
  0x18   : > { %s145_s4 = sshll.u32 %s137_s3, 4  ;;  %p844_p0 = pnand %p524_p13, %p807_p4  ;;  %s840_s4 = int_to_ptr.vmem [resolvable:$true] %s145_s4 }
  0x19   : > { %s134_s6 = scalar_lea.sflag [#allocation4], %s831_s25  ;;  %s595_s7 = scalar_lea.hbm %s838_s30, 512 }
  0x1a   : > { %p596_p2 = scmp.ne.s32.totalorder %s838_s30, %s595_s7  ;;  %p597_p3 = pneg %p844_p0 }
  0x1b   : > { %s600_s16 = scalar_lea.hbm %s1007_s0, 1024  ;;  %p601_p4 = scmp.lt.u32.totalorder %s838_s30, %s1007_s0 }
  0x1c   : > { %p598_p5 = pnand %p597_p3, %p596_p2  ;;  %p602_p7 = scmp.lt.u32.totalorder %s600_s16, %s595_s7 }
  0x1d   : > { %p604_p13 = scmp.lt.u32.totalorder %s595_s7, %s838_s30 }
  0x1e   : > { %p599_p6 = pneg %p598_p5  ;;  %p603_p10 = por %p602_p7, %p601_p4 }
  0x20   : > { %p605_p12 = por %p604_p13, %p603_p10 }
  0x22   : > { %p606_p1 = pnand %p605_p12, %p599_p6 }
  0x24   : > { %609 = shalt.err (!%p606_p1)
}
  0x25   : > { %s610_s20 = scalar_lea.vmem %s840_s4, 512  ;;  %s743_s26 = smov [#allocation3]  }
  0x26   : > { %p611_p2 = scmp.ne.s32.totalorder %s840_s4, %s610_s20  ;;  %s615_s27 = sshll.u32 %s743_s26, 4  ;;  %s616_s27 = int_to_ptr.vmem [resolvable:$false] %s615_s27 }
  0x27   : > { %s617_s28 = scalar_lea.vmem %s616_s27, 1024  ;;  %p618_p9 = scmp.lt.s32.totalorder %s840_s4, %s616_s27 }
  0x28   : > { %p613_p5 = pnand %p611_p2, %p597_p3  ;;  %p619_p4 = scmp.lt.s32.totalorder %s617_s28, %s610_s20 }
  0x2a   : > { %p614_p11 = pneg %p613_p5  ;;  %p620_p7 = por %p619_p4, %p618_p9 }
  0x2c   : > { %p621_p10 = pnand %p620_p7, %p614_p11 }
  0x2e   : > { %624 = shalt.err (!%p621_p10)
}
  0x2f   : > { %s744_s29 = smov 128   ;;  %s745_s3 = smov 8  }
  0x30   : > { %516 = dma.hbm_to_vmem [thread:$0]  (!%p844_p0), %s838_s30, 512, %s840_s4, %s134_s6, %s744_s29, %s744_s29, %s745_s3  }
  0x31   : > { %p172_p12 = scmp.lt.s32.totalorder %s741_s14, 3  ;;  %s492_s7 = sshll.u32 %s831_s25, 3 }
  0x32   : > { %s493_s8 = sshll.u32 %s737_s13, 7  ;;  %p1017_p9 = scmp.ge.s32.totalorder %s741_s14, 1 }
  0x33   : > { %s889_s19 = scalar_lea.hbm %s1008_s1, %s493_s8  ;;  %s159_s20 = scalar_lea.vmem [#allocation6], %s492_s7 }
  0x34   : > { %p882_p11 = pnand %p1017_p9, %p172_p12  ;;  %s167_s26 = sshll.u32 %s159_s20, 4  ;;  %s168_s26 = int_to_ptr.vmem [resolvable:$true] %s167_s26 }
  0x35   : > { %s156_s30 = scalar_lea.sflag [#allocation7], %s831_s25  ;;  %s625_s4 = scalar_lea.hbm %s889_s19, 128 }
  0x36   : > { %s1018_s15 = scalar_select %p882_p11, 1, 0 }
  0x37   : > { %p626_p1 = scmp.ne.s32.totalorder %s889_s19, %s625_s4  ;;  %s630_s28 = scalar_lea.hbm %s1008_s1, 256 }
  0x38   : > { %p631_p2 = scmp.lt.u32.totalorder %s889_s19, %s1008_s1  ;;  %p632_p5 = scmp.lt.u32.totalorder %s630_s28, %s625_s4 }
  0x39   : > { %p628_p6 = pnand %p626_p1, %p597_p3  ;;  %p634_p7 = scmp.lt.u32.totalorder %s625_s4, %s889_s19 }
  0x3a   : > { %p633_p4 = por %p632_p5, %p631_p2 }
  0x3b   : > { %p629_p13 = pneg %p628_p6 }
  0x3c   : > { %p635_p10 = por %p634_p7, %p633_p4 }
  0x3e   : > { %p636_p12 = pnand %p635_p10, %p629_p13 }
  0x40   : > { %639 = shalt.err (!%p636_p12)
}
  0x41   : > { %s640_s25 = scalar_lea.vmem %s168_s26, 128  ;;  %s746_s7 = smov [#allocation6]  }
  0x42   : > { %p641_p9 = scmp.ne.s32.totalorder %s168_s26, %s640_s25  ;;  %s645_s8 = sshll.u32 %s746_s7, 4  ;;  %s646_s8 = int_to_ptr.vmem [resolvable:$false] %s645_s8 }
  0x43   : > { %s647_s16 = scalar_lea.vmem %s646_s8, 256  ;;  %p648_p8 = scmp.lt.s32.totalorder %s168_s26, %s646_s8 }
  0x44   : > { %p643_p1 = pnand %p641_p9, %p597_p3  ;;  %p649_p11 = scmp.lt.s32.totalorder %s647_s16, %s640_s25 }
  0x46   : > { %p644_p6 = pneg %p643_p1  ;;  %p650_p2 = por %p649_p11, %p648_p8 }
  0x48   : > { %p651_p5 = pnand %p650_p2, %p644_p6 }
  0x4a   : > { %654 = shalt.err (!%p651_p5)
}
  0x4b   : > { %519 = dma.hbm_to_vmem [thread:$0]  (!%p844_p0), %s889_s19, 128, %s168_s26, %s156_s30  }
  0x4c   : > { %p1019_p13 = scmp.ne.s32.totalorder %s1018_s15, 0 }
  0x4d   : > { %s914_s18 = sand.u32 (!%p1019_p13), 1, %s725_s10   ;;  %p1020_p3 = scmp.ne.s32.totalorder (!%p1019_p13), %s1013_s21, 0 }
  0x4e   : > { %176 = sbr.rel (%p1019_p13) target bundleno = 136 (0x88), region = 28  ;;  %s495_s20 = sshll.u32 (!%p1019_p13), %s914_s18, 5 }
  0x4f   : > { %s179_s4 = scalar_lea.sflag (!%p1019_p13), [#allocation4], %s914_s18  ;;  %s182_s6 = scalar_lea.vmem (!%p1019_p13), [#allocation3], %s495_s20 }
  0x55   : > { %708 = dma.done.wait (%p1020_p3), %s179_s4, 512  }
  0x56   : > { %710 = vsyncadd (%p1020_p3), %s179_s4, 4294966784  ;;  %s496_s5 = sshll.u32 %s914_s18, 3  ;;  %s188_s15 = scalar_lea.sflag [#allocation7], %s914_s18 }
  0x57   : > { %s191_s19 = scalar_lea.vmem [#allocation6], %s496_s5 }
  0x58   : > { %712 = dma.done.wait (%p1020_p3), %s188_s15, 128  }
  0x59   : > { %714 = vsyncadd (%p1020_p3), %s188_s15, 4294967168  ;;  %s505_s26 = smul.u32 96, %s914_s18  ;;  %v233_v0 = vld [vmem:[%s182_s6] sm:$0xff]  ;;  %v234_v2 = vld [vmem:[%s182_s6 + $0x8] sm:$0xff]  ;;  %v747_v7 = vmov 0.0   ;;  %s365_s3 = scalar_lea.sflag [#allocation5], %s914_s18 }
  0x5a   : > { %v237_v1 = vld [vmem:[%s191_s19] sm:$0xff]  ;;  %v497_v3 = vmul.f32 -1.442695, %v233_v0  ;;  %v498_v4 = vmul.f32 -1.442695, %v234_v2  ;;  %v235_v5 = vld [vmem:[%s182_s6 + $0x10] sm:$0xff] }
  0x5b   : > { %vm262_vm0 = vcmp.eq.s32.totalorder %v237_v1, 0  ;;  %vm280_vm1 = vcmp.eq.s32.totalorder %v237_v1, 1  ;;  %vm299_vm2 = vcmp.eq.s32.totalorder %v237_v1, 2  ;;  %v236_v6 = vld [vmem:[%s182_s6 + $0x18] sm:$0xff]  ;;  %vm318_vm3 = vcmp.eq.s32.totalorder %v237_v1, 3  ;;  %s931_s21 = scalar_lea.vmem [#allocation8], %s505_s26 }
  0x5c   : > { %v265_v8 = vsel %vm262_vm0, 1.0, %v747_v7  ;;  %v283_v9 = vsel %vm280_vm1, 1.0, %v747_v7  ;;  %579 = vpow2.f32 %v497_v3  ;;  %v499_v10 = vmul.f32 -1.442695, %v235_v5  ;;  %s506_s30 = smul.u32 1536, %s733_s12  ;;  %s378_s27 = sshll.u32 %s931_s21, 4  ;;  %s955_s27 = int_to_ptr.vmem [resolvable:$true] %s378_s27 }
  0x5d   : > { %v500_v11 = vmul.f32 -1.442695, %v236_v6  ;;  %356 = vst [vmem:[%s931_s21 + $0x20] sm:$0xff] %v265_v8  ;;  %357 = vst [vmem:[%s931_s21 + $0x28] sm:$0xff] %v283_v9  ;;  %v302_v12 = vsel %vm299_vm2, 1.0, %v747_v7  ;;  %581 = vpow2.f32 %v498_v4  ;;  %v321_v13 = vsel %vm318_vm3, 1.0, %v747_v7 }
  0x5e   : > { %358 = vst [vmem:[%s931_s21 + $0x30] sm:$0xff] %v302_v12  ;;  %583 = vpow2.f32 %v499_v10  ;;  %359 = vst [vmem:[%s931_s21 + $0x38] sm:$0xff] %v321_v13  ;;  %s953_s29 = scalar_lea.hbm %s1009_s2, %s506_s30  ;;  %s655_s25 = scalar_lea.vmem %s955_s27, 1536 }
  0x5f   : > { %585 = vpow2.f32 %v500_v11  ;;  %p656_p8 = scmp.ne.s32.totalorder %s955_s27, %s655_s25  ;;  %p1021_p0 = scmp.ne.s32.totalorder %s1014_s22, 0 }
  0x60   : > { %s748_s7 = smov [#allocation8]  }
  0x61   : > { %p657_p11 = pnand %p656_p8, %p1021_p0  ;;  %s659_s8 = sshll.u32 %s748_s7, 4  ;;  %s660_s8 = int_to_ptr.vmem [resolvable:$false] %s659_s8 }
  0x62   : > { %s661_s16 = scalar_lea.vmem %s660_s8, 3072  ;;  %p662_p7 = scmp.lt.s32.totalorder %s955_s27, %s660_s8 }
  0x63   : > { %p658_p4 = pneg %p657_p11  ;;  %p663_p10 = scmp.lt.s32.totalorder %s661_s16, %s655_s25 }
  0x65   : > { %p664_p12 = por %p663_p10, %p662_p7 }
  0x66   : > { %v580_v14 = vpop.eup %579 }
  0x67   : > { %v582_v15 = vpop.eup %581  ;;  %v250_v16 = vadd.f32 1.0, %v580_v14  ;;  %p665_p9 = pnand %p664_p12, %p658_p4 }
  0x68   : > { %v584_v17 = vpop.eup %583  ;;  %v251_v18 = vadd.f32 1.0, %v582_v15 }
  0x69   : > { %v586_v19 = vpop.eup %585  ;;  %587 = vrcp.f32 %v250_v16  ;;  %v252_v20 = vadd.f32 1.0, %v584_v17 }
  0x6a   : > { %589 = vrcp.f32 %v251_v18  ;;  %v253_v21 = vadd.f32 1.0, %v586_v19 }
  0x6b   : > { %591 = vrcp.f32 %v252_v20 }
  0x6c   : > { %593 = vrcp.f32 %v253_v21 }
  0x73   : > { %v588_v22 = vpop.eup %587 }
  0x74   : > { %v590_v23 = vpop.eup %589  ;;  %v263_v24 = vsel %vm262_vm0, %v588_v22, 0.0  ;;  %v267_v25 = vmul.f32 %v588_v22, %v588_v22 }
  0x75   : > { %v592_v26 = vpop.eup %591  ;;  %352 = vst [vmem:[%s931_s21] sm:$0xff] %v263_v24  ;;  %v281_v27 = vsel %vm280_vm1, %v590_v23, 0.0  ;;  %v285_v28 = vmul.f32 %v590_v23, %v590_v23 }
  0x76   : > { %v594_v29 = vpop.eup %593  ;;  %353 = vst [vmem:[%s931_s21 + $0x8] sm:$0xff] %v281_v27  ;;  %v300_v30 = vsel %vm299_vm2, %v592_v26, 0.0  ;;  %360 = vst [vmem:[%s931_s21 + $0x40] sm:$0xff] %v267_v25  ;;  %v304_v31 = vmul.f32 %v592_v26, %v592_v26 }
  0x77   : > { %354 = vst [vmem:[%s931_s21 + $0x10] sm:$0xff] %v300_v30  ;;  %v319_v32 = vsel %vm318_vm3, %v594_v29, 0.0  ;;  %361 = vst [vmem:[%s931_s21 + $0x48] sm:$0xff] %v285_v28  ;;  %v323_v33 = vmul.f32 %v594_v29, %v594_v29 }
  0x78   : > { %355 = vst [vmem:[%s931_s21 + $0x18] sm:$0xff] %v319_v32  ;;  %362 = vst [vmem:[%s931_s21 + $0x50] sm:$0xff] %v304_v31 }
  0x79   : > { %363 = vst [vmem:[%s931_s21 + $0x58] sm:$0xff] %v323_v33 }
  0x7a   : > { %668 = shalt.err (!%p665_p9)
}
  0x7b   : > { %s669_s20 = scalar_lea.hbm %s953_s29, 1536  ;;  %s673_s5 = scalar_lea.hbm %s1009_s2, 3072 }
  0x7c   : > { %p670_p1 = scmp.ne.s32.totalorder %s953_s29, %s669_s20  ;;  %p674_p5 = scmp.lt.u32.totalorder %s953_s29, %s1009_s2 }
  0x7d   : > { %p675_p13 = scmp.lt.u32.totalorder %s673_s5, %s669_s20  ;;  %p677_p8 = scmp.lt.u32.totalorder %s669_s20, %s953_s29 }
  0x7e   : > { %p671_p6 = pnand %p670_p1, %p1021_p0 }
  0x7f   : > { %p676_p3 = por %p675_p13, %p674_p5 }
  0x80   : > { %p672_p2 = pneg %p671_p6 }
  0x81   : > { %p678_p11 = por %p677_p8, %p676_p3 }
  0x83   : > { %p679_p4 = pnand %p678_p11, %p672_p2 }
  0x85   : > { %682 = shalt.err (!%p679_p4)
}
  0x86   : > { %s749_s26 = smov 128   ;;  %s750_s21 = smov 8  }
  0x87   : > { %511 = dma.vmem_to_hbm [thread:$0]  (%p1021_p0), %s955_s27, 1536, %s953_s29, %s365_s3, %s749_s26, %s749_s26, %s750_s21  }
  0x88 PF: > { %s393_s30 = sand.u32 1, %s721_s9   ;;  %p1022_p7 = scmp.ne.s32.totalorder %s1015_s24, 0 }
  0x89   : > { %p1023_p10 = scmp.ge.s32.totalorder %s741_s14, 2  ;;  %s394_s12 = scalar_lea.sflag [#allocation5], %s393_s30 }
  0x8b   : > { %p521_p12 = pnand %p1023_p10, %p1022_p7 }
  0x8d   : > { %716 = dma.done.wait (!%p521_p12), %s394_s12, 1536  }
  0x8e   : > { %718 = vsyncadd (!%p521_p12), %s394_s12, 4294965760  ;;  %s21_s14 = sadd.s32 1, %s741_s14   ;;  %s1024_s9 = smov %s725_s10 }
  0x8f   : > { %p18_p9 = scmp.ge.s32.totalorder %s21_s14, 4   ;;  %s1025_s10 = smov %s729_s11 }
  0x90   : > { %s1026_s11 = smov %s822_s23  ;;  %s1027_s12 = smov %s737_s13 }
  0x91   : > { %s1028_s13 = smov %s1030_s17  ;;  %20 = sbr.rel (!%p18_p9) target bundleno = 8 (0x8), region = 105 }
  0x98   :  { %399 = vsyncpa [#allocation4], 1 }
  0x99   :  { %401 = vsyncpa [#allocation4 + $0x1], 1 }
  0x9a   :  { %402 = vsyncpa [#allocation7], 1 }
  0x9b   :  { %404 = vsyncpa [#allocation7 + $0x1], 1 }
  0x9c   :  { %405 = vsyncpa [#allocation5], 1 }
  0x9d   :  { %407 = vsyncpa [#allocation5 + $0x1], 1 }

</bundles_post_ra>
